<compile_context>
chip_gen: v7x
topology: tpu7x:2x2x1
jax: 0.10.0
libtpu: 0.0.40
codegen_flags: <defaults>
</compile_context>

<pallas_src>
import jax
import jax.numpy as jnp
from jax.experimental import pallas as pl
from jax.experimental.pallas import tpu as pltpu

_LANE = 128


def _round_up(n, m):
    return ((n + m - 1) // m) * m


def _vmem_capacity_bytes():
    try:
        return int(pltpu.get_tpu_info().vmem_capacity_bytes)
    except Exception:  # conservative fallback (v7x-sized)
        return 64 * 1024 * 1024


def _snake_kernel(x_ref, p_ref, o_ref):
    # x_ref / o_ref: (tR, tT); p_ref: (3, tR, 1) f32
    #   p_ref[0] = alpha, p_ref[1] = beta/(alpha+1e-8), p_ref[2] = gamma
    x = x_ref[...].astype(jnp.float32)
    a = p_ref[0]        # (tR, 1)
    scale = p_ref[1]    # (tR, 1)
    g = p_ref[2]        # (tR, 1)
    s = jnp.sin(a * x)
    o_ref[...] = (x + scale * (s * s) - g).astype(o_ref.dtype)


def snake1d(x, alpha, beta, gamma, *, tile_budget_bytes=None):
    """x: (B, C, T); alpha/beta/gamma: (1, C, 1) like the PyTorch module."""
    B, C, T = x.shape
    R = B * C
    itemsize = jnp.dtype(x.dtype).itemsize
    sub = {4: 8, 2: 16, 1: 32}.get(itemsize, 8)   # sublane packing multiple

    # ---- generation-aware per-buffer VMEM budget -------------------------
    vmem_cap = _vmem_capacity_bytes()
    if tile_budget_bytes is None:
        pipeline_budget = min(vmem_cap // 2, 48 * 1024 * 1024)
        tile_budget_bytes = pipeline_budget // 4       # in+out, double-buffered
    tile_budget = max(int(tile_budget_bytes), sub * _LANE * itemsize)
    vmem_limit = int(min(vmem_cap, 4 * tile_budget + 8 * 1024 * 1024))

    # ---- tile selection ---------------------------------------------------
    # Time tile: full T if it fits with a minimal row tile, else a large
    # multiple of 128 (lane-dense stores; at most one masked tail block).
    if T * sub * itemsize <= tile_budget:
        tT = T
    else:
        tT = max(_LANE, (tile_budget // (sub * itemsize)) // _LANE * _LANE)
    # Row tile: full row extent if it fits, else a sublane-packing multiple.
    if R * tT * itemsize <= tile_budget:
        tR = R
    else:
        tR = max(sub, (tile_budget // (tT * itemsize)) // sub * sub)

    # Keep at least 2 grid blocks on non-trivial inputs so v7x's two
    # TensorCores both get work (harmless no-op on v5e/v6e).
    if pl.cdiv(R, tR) * pl.cdiv(T, tT) < 2 and R * T * itemsize > (2 << 20):
        if T >= 2 * _LANE:
            tT = _round_up(pl.cdiv(T, 2), _LANE)
        elif R >= 2 * sub:
            tR = _round_up(pl.cdiv(R, 2), sub)

    grid = (pl.cdiv(R, tR), pl.cdiv(T, tT))

    # ---- flatten & fuse per-row params (f32; epsilon math stays f32) -----
    x2 = x.reshape(R, T)
    a32 = jnp.broadcast_to(alpha.astype(jnp.float32).reshape(1, C), (B, C)).reshape(R, 1)
    b32 = jnp.broadcast_to(beta.astype(jnp.float32).reshape(1, C), (B, C)).reshape(R, 1)
    g32 = jnp.broadcast_to(gamma.astype(jnp.float32).reshape(1, C), (B, C)).reshape(R, 1)
    params = jnp.stack([a32, b32 / (a32 + 1e-8), g32], axis=0)   # (3, R, 1)

    cost = pl.CostEstimate(
        flops=5 * R * T,
        transcendentals=R * T,
        bytes_accessed=2 * R * T * itemsize + 3 * R * 4,
    )

    out2 = pl.pallas_call(
        _snake_kernel,
        out_shape=jax.ShapeDtypeStruct((R, T), x.dtype),
        grid_spec=pltpu.PrefetchScalarGridSpec(
            num_scalar_prefetch=0,
            grid=grid,
            in_specs=[
                pl.BlockSpec((tR, tT), lambda r, t: (r, t)),
                # fused per-row params; block index constant along the time
                # axis so the tiny block is fetched once per row stripe
                pl.BlockSpec((3, tR, 1), lambda r, t: (0, r, 0)),
            ],
            out_specs=pl.BlockSpec((tR, tT), lambda r, t: (r, t)),
        ),
        compiler_params=pltpu.CompilerParams(
            dimension_semantics=("parallel", "parallel"),
            vmem_limit_bytes=vmem_limit,
        ),
        cost_estimate=cost,
    )(x2, params)

    return out2.reshape(B, C, T)


def _reference(x, alpha, beta, gamma):
    return x + beta * (1.0 / (alpha + 1e-8)) * jnp.sin(alpha * x) ** 2 - gamma


if __name__ == "__main__":
    key = jax.random.PRNGKey(0)
    kx, kx2, ka, kb, kg = jax.random.split(key, 5)

    # 1) Small shapes, default Snake1d init (alpha = beta = 1, gamma = 0).
    B, C, T = 2, 4, 16
    x = jax.random.normal(kx, (B, C, T), dtype=jnp.float32)
    alpha = jnp.ones((1, C, 1), dtype=jnp.float32)
    beta = jnp.ones((1, C, 1), dtype=jnp.float32)
    gamma = jnp.zeros((1, C, 1), dtype=jnp.float32)
    out = jax.block_until_ready(snake1d(x, alpha, beta, gamma))
    assert out.shape == (B, C, T)
    assert jnp.allclose(out, _reference(x, alpha, beta, gamma), atol=1e-5, rtol=1e-5)

    # 2) Ragged row/time tiles (forced small tile budget) + random params
    #    including small alpha (stresses the 1/(alpha+eps) path).
    B2, C2, T2 = 3, 5, 300
    x2 = jax.random.normal(kx2, (B2, C2, T2), dtype=jnp.float32)
    alpha2 = jax.random.uniform(ka, (1, C2, 1), jnp.float32, minval=1e-4, maxval=2.0)
    beta2 = jax.random.uniform(kb, (1, C2, 1), jnp.float32, minval=0.5, maxval=1.5)
    gamma2 = 0.1 * jax.random.normal(kg, (1, C2, 1), dtype=jnp.float32)
    out2 = jax.block_until_ready(
        snake1d(x2, alpha2, beta2, gamma2, tile_budget_bytes=8 * 1024))
    assert jnp.allclose(out2, _reference(x2, alpha2, beta2, gamma2),
                        atol=1e-4, rtol=1e-4)

    # 3) bf16 I/O (f32 math inside the kernel; params stay f32).
    xb = x2.astype(jnp.bfloat16)
    outb = jax.block_until_ready(snake1d(xb, alpha2, beta2, gamma2))
    assert outb.dtype == jnp.bfloat16
    refb = _reference(xb.astype(jnp.float32), alpha2, beta2, gamma2)
    assert jnp.allclose(outb.astype(jnp.float32), refb, atol=5e-2, rtol=5e-2)

    print("KERNEL_OK")
</pallas_src>

<mosaic_0001>
module attributes {stable_mosaic.version = 11 : i64} {
  func.func @_snake_kernel(%arg0: i32, %arg1: i32, %arg2: memref<8x16xf32, #tpu.memory_space<vmem>>, %arg3: memref<3x8x1xf32, #tpu.memory_space<vmem>>, %arg4: memref<8x16xf32, #tpu.memory_space<vmem>>) attributes {dimension_semantics = [#tpu.dimension_semantics<parallel>, #tpu.dimension_semantics<parallel>], iteration_bounds = array<i64: 1, 1>, scalar_prefetch = 0 : i64, scratch_operands = 0 : i64, tpu.core_type = #tpu.core_type<tc>, window_params = [{transform_indices = @transform_0, window_bounds = array<i64: 8, 16>}, {transform_indices = @transform_1, window_bounds = array<i64: 3, 8, 1>}, {transform_indices = @transform_2, window_bounds = array<i64: 8, 16>}]} {
    %c0 = arith.constant 0 : index
    %c0_0 = arith.constant 0 : index
    %0 = vector.load %arg2[%c0, %c0_0] : memref<8x16xf32, #tpu.memory_space<vmem>>, vector<8x16xf32>
    %c0_1 = arith.constant 0 : index
    %c0_2 = arith.constant 0 : index
    %c0_3 = arith.constant 0 : index
    %1 = vector.load %arg3[%c0_1, %c0_2, %c0_3] : memref<3x8x1xf32, #tpu.memory_space<vmem>>, vector<1x8x1xf32>
    %2 = vector.shape_cast %1 : vector<1x8x1xf32> to vector<8x1xf32>
    %c1 = arith.constant 1 : index
    %c0_4 = arith.constant 0 : index
    %c0_5 = arith.constant 0 : index
    %3 = vector.load %arg3[%c1, %c0_4, %c0_5] : memref<3x8x1xf32, #tpu.memory_space<vmem>>, vector<1x8x1xf32>
    %4 = vector.shape_cast %3 : vector<1x8x1xf32> to vector<8x1xf32>
    %c2 = arith.constant 2 : index
    %c0_6 = arith.constant 0 : index
    %c0_7 = arith.constant 0 : index
    %5 = vector.load %arg3[%c2, %c0_6, %c0_7] : memref<3x8x1xf32, #tpu.memory_space<vmem>>, vector<1x8x1xf32>
    %6 = vector.shape_cast %5 : vector<1x8x1xf32> to vector<8x1xf32>
    %7 = vector.broadcast %2 : vector<8x1xf32> to vector<8x16xf32>
    %8 = arith.mulf %7, %0 : vector<8x16xf32>
    %9 = math.sin %8 : vector<8x16xf32>
    %10 = arith.mulf %9, %9 : vector<8x16xf32>
    %11 = vector.broadcast %4 : vector<8x1xf32> to vector<8x16xf32>
    %12 = arith.mulf %11, %10 : vector<8x16xf32>
    %13 = arith.addf %0, %12 : vector<8x16xf32>
    %14 = vector.broadcast %6 : vector<8x1xf32> to vector<8x16xf32>
    %15 = arith.subf %13, %14 : vector<8x16xf32>
    %c0_8 = arith.constant 0 : index
    %c0_9 = arith.constant 0 : index
    %16 = vector.load %arg4[%c0_8, %c0_9] : memref<8x16xf32, #tpu.memory_space<vmem>>, vector<8x16xf32>
    tpu.vector_store %arg4[%c0_8, %c0_9], %15 {strides = array<i32>} : memref<8x16xf32, #tpu.memory_space<vmem>>, vector<8x16xf32>,
    return
  }
  func.func @transform_0(%arg0: i32, %arg1: i32) -> (i32, i32) {
    %c0_i32 = arith.constant 0 : i32
    return %arg0, %arg1 : i32, i32
  }
  func.func @transform_1(%arg0: i32, %arg1: i32) -> (i32, i32, i32) {
    %c0_i32 = arith.constant 0 : i32
    %c0_i32_0 = arith.constant 0 : i32
    %c0_i32_1 = arith.constant 0 : i32
    return %c0_i32, %arg0, %c0_i32_0 : i32, i32, i32
  }
  func.func @transform_2(%arg0: i32, %arg1: i32) -> (i32, i32) {
    %c0_i32 = arith.constant 0 : i32
    return %arg0, %arg1 : i32, i32
  }
}

</mosaic_0001>

<bundles_post_ra>
// kernel: tpu_custom_call.1
= control target key start
LH: loop header
LB: loop body
LE: loop exit
PB: predicated region body
PF: predicated region fallthrough
CT: control target
= control target key end

     0   :  { %v206_v2 = vmov 0   ;;  %s278_s0 = inlined_call_operand.vmem [shape: f32[8,16], index: 0, kind: input, shape index: {}]   ;;  %s279_s1 = inlined_call_operand.vmem [shape: f32[3,8,1], index: 1, kind: input, shape index: {}]   ;;  %s280_s2 = inlined_call_operand.hbm [shape: f32[8,16], index: 2, kind: output, shape index: {}]  }
   0x1   :  { %v13_v0 = vld [vmem:[%s279_s1] sm:$0xff]  ;;  %v159_v1 = vld [vmem:[%s279_s1 + $0x10] sm:$0xff]  ;;  %176 = vset.pattern.permute.xlu0 %v206_v2  ;;  %177 = vset.pattern.permute.xlu1 %v206_v2  ;;  %v158_v3 = vld [vmem:[%s279_s1 + $0x8] sm:$0xff] }
   0x2   :  { %20 = vperm.xlu0 %176, %v13_v0   ;;  %138 = vperm.xlu1 %177, %v159_v1  }
   0x3   :  { %7 = vsyncpa [#allocation3], 0  ;;  %v241_v4 = vld [vmem:[%s278_s0] sm:$0xff]  ;;  %v207_v17 = vmov 683565275   ;;  %s213_s0 = smov [#allocation2]  }
   0x4   :  { %v208_v19 = vmov 2475754826   ;;  %v209_v22 = vmov 2131351028   ;;  %v210_v25 = vmov 2102212464  }
   0x5   :  { %v211_v28 = vmov 920167782   ;;  %v212_v31 = vmov 1326507024   ;;  %s150_s1 = sshll.u32 %s213_s0, 4  ;;  %vm142_vm13 = vcmask 130048   ;;  %s151_s1 = int_to_ptr.vmem [resolvable:$true] %s150_s1 }
   0x6   :  { %131 = vperm.xlu0 %176, %v158_v3   ;;  %s182_s17 = scalar_lea.vmem %s151_s1, 128  ;;  %p187_p1 = scmp.lt.s32.totalorder %s151_s1, %s151_s1 }
   0x7   :  { %p183_p0 = scmp.ne.s32.totalorder %s151_s1, %s182_s17  ;;  %p188_p2 = scmp.lt.s32.totalorder %s182_s17, %s182_s17 }
   0x9   :  { %p189_p3 = por %p188_p2, %p187_p1 }
   0xb   :  { %p190_p4 = pnand %p189_p3, %p183_p0 }
  0x81   :  { %v21_v5 = vpop.permute.xlu0 %20 }
  0x82   :  { %v244_v6 = vmul.f32 %v21_v5, %v241_v4 }
  0x84   :  { %v27_v7 = vand.u32 2139095040, %v244_v6  ;;  %v24_v11 = vand.u32 2147483647, %v244_v6  ;;  %vm26_vm7 = vcmp.lt.s32.totalorder %v244_v6, 0  ;;  %vm116_vm12 = vweird.f32 %v244_v6 }
  0x86   :  { %v28_v8 = vshrl.u32 %v27_v7, 23  ;;  %v31_v14 = vand.u32 8388607, %v24_v11  ;;  %vm25_vm8 = vcmp.le.f32.partialorder %v24_v11, 0.7853982 }
  0x88   :  { %v160_v9 = vadd.s32 4294967169, %v28_v8  ;;  %v32_v33 = vor.u32 8388608, %v31_v14 }
  0x8a   :  { %v34_v10 = vadd.s32 1, %v160_v9  ;;  %v72_v47 = vshll.u32 %v32_v33, 8 }
  0x8c   :  { %vm35_vm0 = vcmp.gt.s32.totalorder %v34_v10, 0 }
  0x8d   :  { %v36_v12 = vsel %vm35_vm0, %v34_v10, 0 }
  0x8e   :  { %v38_v13 = vand.u32 31, %v36_v12  ;;  %v37_v16 = vshrl.u32 %v36_v12, 5 }
  0x90   :  { %v39_v15 = vsub.s32 32, %v38_v13  ;;  %v41_v18 = vshll.u32 %v207_v17, %v38_v13  ;;  %v44_v20 = vshll.u32 %v208_v19, %v38_v13  ;;  %v47_v24 = vshll.u32 %v209_v22, %v38_v13 }
  0x91   :  { %v50_v27 = vshll.u32 %v210_v25, %v38_v13  ;;  %v53_v30 = vshll.u32 %v211_v28, %v38_v13  ;;  %vm56_vm1 = vcmp.lt.s32.totalorder %v37_v16, 1  ;;  %vm59_vm2 = vcmp.lt.s32.totalorder %v37_v16, 4 }
  0x92   :  { %v42_v21 = vshrl.u32 %v208_v19, %v39_v15  ;;  %v45_v23 = vshrl.u32 %v209_v22, %v39_v15  ;;  %v48_v26 = vshrl.u32 %v210_v25, %v39_v15  ;;  %v51_v29 = vshrl.u32 %v211_v28, %v39_v15 }
  0x93   :  { %v54_v32 = vshrl.u32 %v212_v31, %v39_v15  ;;  %v40_v42 = vshrl.u32 %v207_v17, %v39_v15  ;;  %vm58_vm3 = vcmp.lt.s32.totalorder %v37_v16, 3  ;;  %vm57_vm4 = vcmp.lt.s32.totalorder %v37_v16, 2 }
  0x94   :  { %v43_v34 = vor.u32 %v42_v21, %v41_v18  ;;  %v46_v35 = vor.u32 %v45_v23, %v44_v20  ;;  %v49_v36 = vor.u32 %v48_v26, %v47_v24  ;;  %v52_v37 = vor.u32 %v51_v29, %v50_v27 }
  0x95   :  { %v55_v38 = vor.u32 %v54_v32, %v53_v30 }
  0x96   :  { %v61_v39 = vsel %vm59_vm2, %v49_v36, 2102212464  ;;  %v64_v40 = vsel %vm56_vm1, %v43_v34, %v46_v35  ;;  %v68_v41 = vsel %vm56_vm1, %v46_v35, %v49_v36  ;;  %v65_v43 = vsel %vm59_vm2, %v52_v37, 920167782 }
  0x97   :  { %v69_v44 = vsel %vm59_vm2, %v55_v38, 1326507024  ;;  %v66_v45 = vsel %vm58_vm3, %v49_v36, %v65_v43  ;;  %v60_v48 = vsel %vm56_vm1, %v40_v42, %v43_v34  ;;  %v62_v49 = vsel %vm58_vm3, %v46_v35, %v61_v39  ;;  %v139_v39 = vpop.permute.xlu1 %138 }
  0x98   :  { %v70_v46 = vsel %vm58_vm3, %v52_v37, %v69_v44  ;;  %v67_v50 = vsel %vm57_vm4, %v64_v40, %v66_v45  ;;  %v63_v56 = vsel %vm57_vm4, %v60_v48, %v62_v49  ;;  %v132_v37 = vpop.permute.xlu0 %131 }
  0x99   :  { %v71_v51 = vsel %vm57_vm4, %v68_v41, %v70_v46  ;;  %v253_v54 = vmul.u32.u64.low %v72_v47, %v67_v50  ;;  %v254_v55 = vmul.u32.u64.high %v72_v47, %v67_v50, %v253_v54  ;;  %v79_v58 = vmul.u32 %v72_v47, %v63_v56 }
  0x9a   :  { %v250_v52 = vmul.u32.u64.low %v72_v47, %v71_v51  ;;  %v251_v53 = vmul.u32.u64.high %v72_v47, %v71_v51, %v250_v52 }
  0x9b   :  { %v82_v57 = vadd.s32 1, %v254_v55 }
  0x9c   :  { %vm81_vm5 = vc.u32 %v251_v53, %v253_v54  ;;  %v80_v8 = vadd.s32 %v253_v54, %v251_v53 }
  0x9d   :  { %v83_v59 = vsel %vm81_vm5, %v82_v57, %v254_v55 }
  0x9e   :  { %v84_v60 = vadd.s32 %v83_v59, %v79_v58 }
  0xa0   :  { %v85_v61 = vadd.s32 536870912, %v84_v60 }
  0xa2   :  { %v86_v62 = vshrl.u32 %v85_v61, 30 }
  0xa4   :  { %v87_v63 = vshll.u32 %v86_v62, 30  ;;  %v110_v21 = vsub.s32 4, %v86_v62 }
  0xa6   :  { %v88_v0 = vsub.s32 %v84_v60, %v87_v63  ;;  %v111_v24 = vsel %vm26_vm7, %v110_v21, %v86_v62 }
  0xa7   :  { %v113_v26 = vsel %vm25_vm8, 0, %v111_v24 }
  0xa8   :  { %v90_v1 = vsub.s32 0, %v88_v0  ;;  %v117_v27 = vadd.s32 3, %v113_v26 }
  0xaa   :  { %v161_v2 = vmin.u32 %v90_v1, %v88_v0  ;;  %v118_v28 = vand.u32 3, %v117_v27 }
  0xac   :  { %v92_v3 = vclz %v161_v2  ;;  %vm123_vm9 = vcmp.eq.s32.totalorder %v118_v28, 2  ;;  %vm120_vm10 = vcmp.eq.s32.totalorder %v118_v28, 0  ;;  %vm119_vm11 = vcmp.lt.s32.totalorder %v118_v28, 2 }
  0xae   :  { %v162_v5 = vadd.s32 4294967294, %v92_v3 }
  0xb0   :  { %vm163_vm6 = vcmp.lt.s32.totalorder %v162_v5, 0 }
  0xb1   :  { %v95_v7 = vsel %vm163_vm6, 0, %v162_v5 }
  0xb2   :  { %v96_v9 = vsub.s32 32, %v95_v7  ;;  %v100_v10 = vsub.s32 4294967266, %v95_v7  ;;  %v97_v12 = vshll.u32 %v88_v0, %v95_v7 }
  0xb4   :  { %v98_v13 = vshrl.u32 %v80_v8, %v96_v9  ;;  %v101_v14 = vadd.s32 127, %v100_v10 }
  0xb6   :  { %v99_v15 = vor.u32 %v98_v13, %v97_v12  ;;  %v102_v16 = vshll.u32 %v101_v14, 23 }
  0xb8   :  { %v103_v17 = vor.u32 4788187, %v102_v16  ;;  %v106_v19 = vcvt.s32.f32 %v99_v15 }
  0xba   :  { %v104_v18 = vand.u32 2147483647, %v103_v17 }
  0xbc   :  { %v107_v20 = vmul.f32 %v106_v19, %v104_v18 }
  0xbe   :  { %v108_v22 = vxor.u32 2147483648, %v107_v20 }
  0xc0   :  { %v109_v23 = vsel %vm26_vm7, %v108_v22, %v107_v20 }
  0xc1   :  { %v112_v25 = vsel %vm25_vm8, %v244_v6, %v109_v23 }
  0xc2   :  { %178 = vcosq.f32 %v112_v25 }
  0xc3   :  { %180 = vsinq.f32 %v112_v25 }
  0xcc   :  { %v179_v29 = vpop.eup %178 }
  0xcd   :  { %v181_v30 = vpop.eup %180  ;;  %v124_v31 = vxor.u32 2147483648, %v179_v29 }
  0xce   :  { %v121_v32 = vxor.u32 2147483648, %v181_v30 }
  0xcf   :  { %v125_v33 = vsel %vm123_vm9, %v124_v31, %v181_v30 }
  0xd0   :  { %v122_v34 = vsel %vm120_vm10, %v179_v29, %v121_v32 }
  0xd1   :  { %v126_v11 = vsel %vm119_vm11, %v122_v34, %v125_v33 }
  0xd2   :  { %v127_v35 = vsel %vm116_vm12, nan, %v126_v11 }
  0xd3   :  { %v128_v36 = vmul.f32 %v127_v35, %v127_v35 }
  0xd5   :  { %v134_v38 = vmul.f32 %v132_v37, %v128_v36 }
  0xd7   :  { %v135_v40 = vadd.f32 %v134_v38, %v241_v4 }
  0xd9   :  { %v141_v41 = vsub.f32 %v135_v40, %v139_v39 }
  0xdb   :  { %143 = vst.msk [vmem:[#allocation2] sm:$0xff] %vm142_vm13, %v141_v41 }
  0xdc   :  { %193 = shalt.err (!%p190_p4)
}
  0xdd   :  { %s194_s20 = scalar_lea.hbm %s280_s2, 128 }
  0xde   :  { %p195_p5 = scmp.ne.s32.totalorder %s280_s2, %s194_s20  ;;  %p198_p6 = scmp.lt.u32.totalorder %s194_s20, %s280_s2 }
  0xe0   :  { %p200_p7 = pnand %p198_p6, %p195_p5 }
  0xe2   :  { %203 = shalt.err (!%p200_p7)
}
  0xe3   :  { %153 = dma.vmem_to_hbm [thread:$0]  %s151_s1, 128, %s280_s2, [#allocation3]  }
  0xe4   :  { %204 = dma.done.wait [#allocation3], 128  }
  0xe5   :  { %205 = vsyncadd [#allocation3], 4294967168 }
  0xe6   :  { %157 = vsyncpa [#allocation3], 1 }

</bundles_post_ra>
